<compile_context>
chip_gen: v5e
topology: v5e:2x2
jax: 0.10.0
libtpu: 0.0.40
codegen_flags: <defaults>
</compile_context>

<pallas_src>
import math

import jax
import jax.numpy as jnp
from jax.experimental import pallas as pl
from jax.experimental.pallas import tpu as pltpu


# ----------------------------------------------------------------------------
# Kernels (elementwise, 1-in / 1-out, pure VPU — fully hidden under HBM DMA)
# ----------------------------------------------------------------------------
def _clamp_kernel(w_ref, o_ref):
    o_ref[...] = jnp.clip(w_ref[...], 0.0, 1.0).astype(o_ref.dtype)


def _identity_kernel(w_ref, o_ref):
    o_ref[...] = w_ref[...]


# ----------------------------------------------------------------------------
# Tiling policy
# ----------------------------------------------------------------------------
_SMALL_BYPASS_BYTES = 64 * 1024      # below: jnp.clip — per-call overhead dominates
_MAX_BLOCK_BYTES = 2 * 1024 * 1024   # target per-block bytes (x4 double-buffered in+out
                                     #  = 8 MiB working set, < 16 MiB v5e default scoped)
_HARD_BLOCK_BYTES = 4 * 1024 * 1024  # above this per-block: no safe tiling, fall back
_MAX_LANE_COLS = 2048                # keep full lane extent (unmasked vst) up to this


def _sublane_multiple(dtype) -> int:
    # Sub-32-bit dtypes pack along sublanes: f32 -> 8, bf16 -> 16, 8-bit -> 32.
    itemsize = jnp.dtype(dtype).itemsize
    return max(8, 8 * (4 // max(1, itemsize)))


def _largest_aligned_divisor(n: int, limit: int, step: int) -> int:
    """Largest multiple of `step`, <= limit, that exactly divides n (0 if none)."""
    cand = (min(limit, n) // step) * step
    while cand >= step:
        if n % cand == 0:
            return cand
        cand -= step
    return 0


def _choose_leading_block(rows: int, bytes_per_row: int, step: int) -> int:
    """Pick the leading-dim block size: <= VMEM budget, step-aligned, preferring
    an exact divisor of `rows` (unmasked stores), and >= 2 grid blocks when the
    row count allows it (v7x megacore: two TensorCores each stream half)."""
    budget = max(1, _MAX_BLOCK_BYTES // max(1, bytes_per_row))
    cap = rows if rows < 2 * step else rows // 2
    limit = min(rows, budget, cap)
    if limit < step:
        # Cannot form a step-aligned block smaller than the array: use the full
        # extent (always a legal block dim); caller enforces the hard byte cap.
        return rows
    br = _largest_aligned_divisor(rows, limit, step)
    return br if br else (limit // step) * step


def _tiled_elementwise(kernel, w: jax.Array, *, alias: bool):
    """Run a 1-in/1-out elementwise `kernel` over `w` with a lane-dense,
    (sublane,128)-legal tiled grid.  Returns None when no safe tiling exists
    (caller falls back to plain XLA)."""
    dtype = w.dtype
    itemsize = jnp.dtype(dtype).itemsize
    sub = _sublane_multiple(dtype)

    # 0-D / 1-D: reinterpret as a lane-dense 2-D view (free for contiguous arrays).
    if w.ndim < 2:
        n = w.size
        cols = _largest_aligned_divisor(n, _MAX_LANE_COLS, 128)
        if cols == 0:
            return None
        out2d = _tiled_elementwise(kernel, w.reshape(n // cols, cols), alias=alias)
        return None if out2d is None else out2d.reshape(w.shape)

    shape = w.shape
    rows = shape[0]
    trailing = shape[1:]

    if w.ndim == 2:
        cols = trailing[0]
        if cols <= _MAX_LANE_COLS:
            bc = cols  # full lane extent: always legal, unmasked vst
        else:
            bc = _largest_aligned_divisor(cols, _MAX_LANE_COLS, 128) or cols
        bytes_per_row = bc * itemsize
        step = sub  # leading dim is the block's sublane dim
    else:
        bc = None
        bytes_per_row = math.prod(trailing) * itemsize
        step = 1    # leading dim is not one of the block's last two dims

    br = _choose_leading_block(rows, bytes_per_row, step)
    if br * bytes_per_row > _HARD_BLOCK_BYTES:
        return None  # no tiling keeps the working set inside default scoped VMEM

    if w.ndim == 2:
        grid = (pl.cdiv(rows, br), pl.cdiv(trailing[0], bc))
        block = (br, bc)
        index_map = lambda i, j: (i, j)
    else:
        grid = (pl.cdiv(rows, br),)
        block = (br,) + tuple(trailing)
        n_trailing = len(trailing)
        index_map = lambda i, _n=n_trailing: (i,) + (0,) * _n

    spec = pl.BlockSpec(block, index_map)
    return pl.pallas_call(
        kernel,
        out_shape=jax.ShapeDtypeStruct(shape, dtype),
        grid=grid,
        in_specs=[spec],
        out_specs=spec,
        # In-place projection: the pre-constraint weight is dead after the hook,
        # so let the result reuse the same HBM buffer (XLA copies defensively if
        # the caller did not donate the argument).
        input_output_aliases=({0: 0} if alias else {}),
        compiler_params=pltpu.CompilerParams(
            dimension_semantics=("parallel",) * len(grid)),
        cost_estimate=pl.CostEstimate(
            flops=w.size, transcendentals=0,
            bytes_accessed=2 * w.size * itemsize),
    )(w)


# ----------------------------------------------------------------------------
# Public wrappers
# ----------------------------------------------------------------------------
def apply_weight_constraint(weight: jax.Array) -> jax.Array:
    """clamp(weight, 0, 1) — Pallas VPU kernel for anything larger than a few
    vregs, tiled lane-dense and written back in place."""
    if not jnp.issubdtype(weight.dtype, jnp.floating):
        raise TypeError(
            f"weight_constraint expects a floating dtype, got {weight.dtype}"
        )
    nbytes = weight.size * jnp.dtype(weight.dtype).itemsize
    if nbytes < _SMALL_BYPASS_BYTES:
        # One-vreg clamp: fixed kernel-launch overhead dominates; XLA's fused
        # clip is strictly faster and numerically identical.
        return jnp.clip(weight, 0.0, 1.0)
    out = _tiled_elementwise(_clamp_kernel, weight, alias=True)
    if out is None:
        # TODO(synk): shapes with no clean lane-dense tiling (non-128-divisible
        # 1D sizes, huge trailing extents) fall back to XLA's fused clip.
        return jnp.clip(weight, 0.0, 1.0)
    return out


def trainable_source_forward(x, weight: jax.Array) -> jax.Array:
    """TrainableSource.forward(x) -> weight (identity on the parameter).

    No kernel launch, no DMA of x, no HBM round-trip of the weight."""
    del x  # accepted for signature compatibility; semantically unused
    return weight


def trainable_source_forward_materialized(weight: jax.Array) -> jax.Array:
    """Optional: forward's output as a genuinely distinct buffer (tiled Pallas
    copy, no aliasing — the weight stays valid)."""
    nbytes = weight.size * jnp.dtype(weight.dtype).itemsize
    if nbytes < _SMALL_BYPASS_BYTES:
        return jnp.copy(weight)
    out = _tiled_elementwise(_identity_kernel, weight, alias=False)
    return jnp.copy(weight) if out is None else out


class TrainableSource:
    """JAX/Pallas port of enlaight's TrainableSource."""

    def __init__(self, init_weight, weight_constraint=None,
                 apply_constraints_on_init=False):
        self.weight = init_weight
        self.weight_constraint = weight_constraint
        self.trainable = True  # TODO(synk): no autograd requires_grad bookkeeping in JAX port
        if apply_constraints_on_init:
            self.constraints(None, None, 0)

    def constraints(self, outputs=None, batch=None, batch_idx=0):
        """Projected-SGD hook: re-apply the constraint on the weight."""
        if self.weight_constraint is not None and self.trainable:
            self.weight = self.weight_constraint(self.weight)

    def __call__(self, x=None):
        return trainable_source_forward(x, self.weight)


# ----------------------------------------------------------------------------
# Main
# ----------------------------------------------------------------------------
if __name__ == "__main__":
    key = jax.random.PRNGKey(0)
    k_w, k_x, k_big, k_bf, k_flat, k_3d = jax.random.split(key, 6)

    # --- Docstring example: init_weight (12, 11), x of shape (1,). -----------
    init_weight = jax.random.normal(k_w, (12, 11), dtype=jnp.float32)
    x = jax.random.normal(k_x, (1,), dtype=jnp.float32)
    expected_small = jnp.clip(init_weight, 0.0, 1.0)

    source = TrainableSource(
        init_weight=init_weight,
        weight_constraint=apply_weight_constraint,
        apply_constraints_on_init=True,
    )
    out = jax.block_until_ready(source(x))
    assert out.shape == expected_small.shape and out.dtype == expected_small.dtype
    assert bool(jnp.array_equal(out, expected_small))

    # --- Larger f32 prototype bank: tiled Pallas clamp, >=2-block grid. ------
    big_weight = jax.random.normal(k_big, (1024, 256), dtype=jnp.float32)
    big_expected = jnp.clip(big_weight, 0.0, 1.0)
    big_source = TrainableSource(
        init_weight=big_weight,
        weight_constraint=apply_weight_constraint,
        apply_constraints_on_init=True,
    )
    big_out = jax.block_until_ready(big_source(x))
    assert bool(jnp.array_equal(big_out, big_expected))

    # --- bf16 weight (sublane packing 16) through the tiled clamp. -----------
    bf_weight = jax.random.normal(k_bf, (512, 384), dtype=jnp.bfloat16)
    bf_expected = jnp.clip(bf_weight, 0.0, 1.0)
    bf_out = jax.block_until_ready(apply_weight_constraint(bf_weight))
    assert bf_out.dtype == jnp.bfloat16
    assert bool(jnp.array_equal(bf_out, bf_expected))

    # --- 1D weight: reshaped to a lane-dense 2D view inside the wrapper. -----
    flat_weight = jax.random.normal(k_flat, (131072,), dtype=jnp.float32)
    flat_expected = jnp.clip(flat_weight, 0.0, 1.0)
    flat_out = jax.block_until_ready(apply_weight_constraint(flat_weight))
    assert flat_out.shape == flat_weight.shape
    assert bool(jnp.array_equal(flat_out, flat_expected))

    # --- 3D weight: blocks over the leading dim, full trailing extents. ------
    w3d = jax.random.normal(k_3d, (16, 32, 128), dtype=jnp.float32)
    w3d_expected = jnp.clip(w3d, 0.0, 1.0)
    w3d_out = jax.block_until_ready(apply_weight_constraint(w3d))
    assert bool(jnp.array_equal(w3d_out, w3d_expected))

    # --- Optional materialized forward: distinct buffer, no aliasing. --------
    mat = jax.block_until_ready(
        trainable_source_forward_materialized(big_source.weight))
    assert bool(jnp.array_equal(mat, big_expected))

    print("KERNEL_OK")
</pallas_src>

<mosaic_0001>
module attributes {stable_mosaic.version = 11 : i64} {
  func.func @_clamp_kernel(%arg0: i32, %arg1: i32, %arg2: memref<512x256xf32, #tpu.memory_space<vmem>>, %arg3: memref<512x256xf32, #tpu.memory_space<vmem>>) attributes {dimension_semantics = [#tpu.dimension_semantics<parallel>, #tpu.dimension_semantics<parallel>], iteration_bounds = array<i64: 2, 1>, scalar_prefetch = 0 : i64, scratch_operands = 0 : i64, tpu.core_type = #tpu.core_type<tc>, window_params = [{transform_indices = @transform_0, window_bounds = array<i64: 512, 256>}, {transform_indices = @transform_1, window_bounds = array<i64: 512, 256>}]} {
    %c0 = arith.constant 0 : index
    %c0_0 = arith.constant 0 : index
    %0 = vector.load %arg2[%c0, %c0_0] : memref<512x256xf32, #tpu.memory_space<vmem>>, vector<512x256xf32>
    %cst = arith.constant 0.000000e+00 : f32
    %cst_1 = arith.constant 1.000000e+00 : f32
    %1 = vector.broadcast %cst : f32 to vector<512x256xf32>
    %2 = arith.maximumf %1, %0 : vector<512x256xf32>
    %3 = vector.broadcast %cst_1 : f32 to vector<512x256xf32>
    %4 = arith.minimumf %3, %2 : vector<512x256xf32>
    %c0_2 = arith.constant 0 : index
    %c0_3 = arith.constant 0 : index
    %5 = vector.load %arg3[%c0_2, %c0_3] : memref<512x256xf32, #tpu.memory_space<vmem>>, vector<512x256xf32>
    tpu.vector_store %arg3[%c0_2, %c0_3], %4 {strides = array<i32>} : memref<512x256xf32, #tpu.memory_space<vmem>>, vector<512x256xf32>,
    return
  }
  func.func @transform_0(%arg0: i32, %arg1: i32) -> (i32, i32) {
    %c0_i32 = arith.constant 0 : i32
    return %arg0, %arg1 : i32, i32
  }
  func.func @transform_1(%arg0: i32, %arg1: i32) -> (i32, i32) {
    %c0_i32 = arith.constant 0 : i32
    return %arg0, %arg1 : i32, i32
  }
}

</mosaic_0001>

<bundles_post_ra>
// kernel: tpu_custom_call.1
= control target key start
LH: loop header
LB: loop body
LE: loop exit
PB: predicated region body
PF: predicated region fallthrough
CT: control target
= control target key end

     0   :  { %6 = vsyncpa [#allocation3], 0  ;;  %s1374_s0 = inlined_call_operand.hbm [shape: f32[1024,256], index: 0, kind: input, shape index: {}, may-alias: {0,1}]   ;;  %s1375_s1 = inlined_call_operand.hbm [shape: f32[1024,256], index: 1, kind: output, shape index: {}, may-alias: {0,1}]  }
   0x1   :  { %8 = vsyncpa [#allocation3 + $0x1], 0 }
   0x2   :  { %9 = vsyncpa [#allocation4], 0 }
   0x3   :  { %11 = vsyncpa [#allocation4 + $0x1], 0  ;;  %s993_s6 = smov 0   ;;  %s995_s7 = smov 0  }
   0x4   :  { %s997_s8 = smov 0   ;;  %s999_s9 = smov 0  }
   0x5   :  { %s1001_s10 = smov 0   ;;  %s1003_s11 = smov 0  }
   0x6 LB: > { %s778_s12 = sadd.s32 4294967295, %s977_s11   ;;  %s779_s13 = sadd.s32 4294967294, %s977_s11   ;;  %s977_s11 = sphi %s1003_s11, %s17_s11   ;;  %s973_s10 = sphi %s1001_s10, %s1384_s10   ;;  %s969_s9 = sphi %s999_s9, %s1383_s9   ;;  %s965_s8 = sphi %s997_s8, %s1382_s8   ;;  %s961_s7 = sphi %s995_s7, %s1381_s7   ;;  %s957_s6 = sphi %s993_s6, %s1380_s6  }
   0x7   : > { %s29_s14 = sadd.s32 1, %s973_s10  ;;  %s38_s15 = sadd.s32 1, %s965_s8 }
   0x8   : > { %p31_p0 = scmp.ge.s32.totalorder %s29_s14, 2  ;;  %p45_p1 = scmp.ne.s32.totalorder %s965_s8, %s961_s7 }
   0x9   : > { %p46_p2 = scmp.eq.s32.totalorder %s977_s11, 0  ;;  %p51_p3 = scmp.ne.s32.totalorder %s961_s7, %s957_s6 }
   0xa   : > { %s1386_s14 = smov (%p31_p0, %s29_s14), 0  ;;  %p52_p5 = scmp.eq.s32.totalorder %s778_s12, 0 }
   0xb   : > { %p1034_p4 = por %p46_p2, %p45_p1  ;;  %s33_s17 = ssub.s32 %s973_s10, %s1386_s14 }
   0xc   : > { %p77_p6 = scmp.eq.s32.totalorder %s778_s12, 1  ;;  %p36_p7 = scmp.eq.s32.totalorder %s33_s17, 0 }
   0xd   : > { %p1040_p8 = por %p52_p5, %p51_p3  ;;  %p83_p10 = scmp.eq.s32.totalorder %s779_s13, 1 }
   0xe   : > { %p1044_p9 = por %p77_p6, %p45_p1  ;;  %p781_p12 = scmp.ge.s32.totalorder %s977_s11, 2 }
   0xf   : > { %s1049_s20 = scalar_select %p36_p7, %s965_s8, %s38_s15  }
  0x10   : > { %p1051_p11 = por %p83_p10, %p51_p3  ;;  %p811_p13 = scmp.lt.s32.totalorder %s977_s11, 2 }
  0x11   : > { %s103_s22 = sand.u32 1, %s965_s8   ;;  %s796_s24 = sshll.u32 %s973_s10, 10 }
  0x12   : > { %s782_s23 = sshll.u32 %s103_s22, 10  ;;  %s115_s27 = scalar_lea.hbm %s1374_s0, %s796_s24 }
  0x13   : > { %s107_s28 = scalar_lea.vmem [#allocation2], %s782_s23  ;;  %s116_s30 = sshll.u32 %s115_s27, 4  ;;  %s117_s30 = int_to_ptr.hbm [resolvable:$true] %s116_s30 }
  0x14   : > { %s118_s29 = sshll.u32 %s107_s28, 4  ;;  %p804_p0 = pnand %p811_p13, %p1034_p4  ;;  %s119_s29 = int_to_ptr.vmem [resolvable:$true] %s118_s29 }
  0x15   : > { %p786_p1 = scmp.ge.s32.totalorder %s977_s11, 1  ;;  %s104_s2 = scalar_lea.sflag [#allocation3], %s103_s22 }
  0x16   : > { %s979_s3 = smov 256   ;;  %s980_s4 = smov 16  }
  0x17   : > { %806 = dma.hbm_to_vmem [thread:$0]  (!%p804_p0), %s117_s30, 16384, %s119_s29, %s104_s2, %s979_s3, %s979_s3, %s980_s4  }
  0x18   : > { %p126_p2 = scmp.lt.s32.totalorder %s977_s11, 3 }
  0x1a   : > { %p127_p3 = pnand %p786_p1, %p126_p2 }
  0x1b   : > { %s1067_s5 = sand.u32 (!%p127_p3), 1, %s961_s7  }
  0x1c   : > { %130 = sbr.rel (%p127_p3) target bundleno = 170 (0xaa), region = 24  ;;  %s787_s12 = sshll.u32 (!%p127_p3), %s1067_s5, 10 }
  0x1d   : > { %s133_s13 = scalar_lea.sflag (!%p127_p3), [#allocation3], %s1067_s5  ;;  %s1071_s15 = scalar_lea.vmem (!%p127_p3), [#allocation2], %s787_s12 }
  0x21   : > { %948 = dma.done.wait (%p1040_p8), %s133_s13, 16384  }
  0x22   : > { %950 = vsyncadd (%p1040_p8), %s133_s13, 4294950912  ;;  %v160_v0 = vld [vmem:[%s1071_s15] sm:$0xff]  ;;  %v161_v1 = vld [vmem:[%s1071_s15 + $0x8] sm:$0xff]  ;;  %s1088_s16 = scalar_lea.vmem [#allocation5], %s787_s12  ;;  %s798_s17 = sshll.u32 %s969_s9, 10 }
  0x23   : > { %v162_v2 = vld [vmem:[%s1071_s15 + $0x10] sm:$0xff]  ;;  %v288_v3 = vmax.f32 %v160_v0, 0.0  ;;  %v289_v4 = vmax.f32 %v161_v1, 0.0  ;;  %v163_v6 = vld [vmem:[%s1071_s15 + $0x18] sm:$0xff]  ;;  %v164_v7 = vld [vmem:[%s1071_s15 + $0x20] sm:$0xff]  ;;  %s687_s23 = scalar_lea.hbm %s1375_s1, %s798_s17  ;;  %s688_s9 = sshll.u32 %s1088_s16, 4  ;;  %s689_s9 = int_to_ptr.vmem [resolvable:$true] %s688_s9 }
  0x24   : > { %v290_v5 = vmax.f32 %v162_v2, 0.0  ;;  %v165_v8 = vld [vmem:[%s1071_s15 + $0x28] sm:$0xff]  ;;  %v291_v9 = vmax.f32 %v163_v6, 0.0  ;;  %v292_v10 = vmax.f32 %v164_v7, 0.0  ;;  %v166_v12 = vld [vmem:[%s1071_s15 + $0x30] sm:$0xff]  ;;  %v167_v13 = vld [vmem:[%s1071_s15 + $0x38] sm:$0xff] }
  0x25   : > { %v293_v11 = vmax.f32 %v165_v8, 0.0  ;;  %v168_v14 = vld [vmem:[%s1071_s15 + $0x40] sm:$0xff]  ;;  %v416_v15 = vmin.f32 %v288_v3, 1.0  ;;  %v417_v16 = vmin.f32 %v289_v4, 1.0  ;;  %v294_v18 = vmax.f32 %v166_v12, 0.0  ;;  %v169_v19 = vld [vmem:[%s1071_s15 + $0x48] sm:$0xff] }
  0x26   : > { %v418_v17 = vmin.f32 %v290_v5, 1.0  ;;  %v419_v20 = vmin.f32 %v291_v9, 1.0  ;;  %v295_v21 = vmax.f32 %v167_v13, 0.0  ;;  %v170_v22 = vld [vmem:[%s1071_s15 + $0x50] sm:$0xff]  ;;  %v420_v23 = vmin.f32 %v292_v10, 1.0  ;;  %v171_v25 = vld [vmem:[%s1071_s15 + $0x58] sm:$0xff] }
  0x27   : > { %544 = vst [vmem:[%s1088_s16] sm:$0xff] %v416_v15  ;;  %v296_v24 = vmax.f32 %v168_v14, 0.0  ;;  %v421_v26 = vmin.f32 %v293_v11, 1.0  ;;  %v297_v27 = vmax.f32 %v169_v19, 0.0  ;;  %v172_v28 = vld [vmem:[%s1071_s15 + $0x60] sm:$0xff]  ;;  %v422_v29 = vmin.f32 %v294_v18, 1.0  ;;  %v173_v31 = vld [vmem:[%s1071_s15 + $0x68] sm:$0xff] }
  0x28   : > { %545 = vst [vmem:[%s1088_s16 + $0x8] sm:$0xff] %v417_v16  ;;  %v298_v30 = vmax.f32 %v170_v22, 0.0  ;;  %v423_v32 = vmin.f32 %v295_v21, 1.0  ;;  %v299_v33 = vmax.f32 %v171_v25, 0.0  ;;  %v174_v34 = vld [vmem:[%s1071_s15 + $0x70] sm:$0xff]  ;;  %v300_v36 = vmax.f32 %v172_v28, 0.0 }
  0x29   : > { %546 = vst [vmem:[%s1088_s16 + $0x10] sm:$0xff] %v418_v17  ;;  %v424_v35 = vmin.f32 %v296_v24, 1.0  ;;  %v175_v37 = vld [vmem:[%s1071_s15 + $0x78] sm:$0xff]  ;;  %v425_v38 = vmin.f32 %v297_v27, 1.0  ;;  %v301_v39 = vmax.f32 %v173_v31, 0.0  ;;  %v176_v40 = vld [vmem:[%s1071_s15 + $0x80] sm:$0xff] }
  0x2a   : > { %547 = vst [vmem:[%s1088_s16 + $0x18] sm:$0xff] %v419_v20  ;;  %v426_v41 = vmin.f32 %v298_v30, 1.0  ;;  %v302_v42 = vmax.f32 %v174_v34, 0.0  ;;  %v177_v43 = vld [vmem:[%s1071_s15 + $0x88] sm:$0xff]  ;;  %v427_v44 = vmin.f32 %v299_v33, 1.0  ;;  %v303_v45 = vmax.f32 %v175_v37, 0.0 }
  0x2b   : > { %548 = vst [vmem:[%s1088_s16 + $0x20] sm:$0xff] %v420_v23  ;;  %v178_v46 = vld [vmem:[%s1071_s15 + $0x90] sm:$0xff]  ;;  %v428_v47 = vmin.f32 %v300_v36, 1.0  ;;  %v304_v48 = vmax.f32 %v176_v40, 0.0  ;;  %v179_v49 = vld [vmem:[%s1071_s15 + $0x98] sm:$0xff]  ;;  %v429_v50 = vmin.f32 %v301_v39, 1.0 }
  0x2c   : > { %549 = vst [vmem:[%s1088_s16 + $0x28] sm:$0xff] %v421_v26  ;;  %v305_v51 = vmax.f32 %v177_v43, 0.0  ;;  %v180_v52 = vld [vmem:[%s1071_s15 + $0xa0] sm:$0xff]  ;;  %v430_v53 = vmin.f32 %v302_v42, 1.0  ;;  %v306_v54 = vmax.f32 %v178_v46, 0.0  ;;  %v181_v55 = vld [vmem:[%s1071_s15 + $0xa8] sm:$0xff] }
  0x2d   : > { %550 = vst [vmem:[%s1088_s16 + $0x30] sm:$0xff] %v422_v29  ;;  %v431_v56 = vmin.f32 %v303_v45, 1.0  ;;  %v307_v57 = vmax.f32 %v179_v49, 0.0  ;;  %v182_v58 = vld [vmem:[%s1071_s15 + $0xb0] sm:$0xff]  ;;  %v432_v59 = vmin.f32 %v304_v48, 1.0  ;;  %v308_v60 = vmax.f32 %v180_v52, 0.0 }
  0x2e   : > { %551 = vst [vmem:[%s1088_s16 + $0x38] sm:$0xff] %v423_v32  ;;  %v183_v61 = vld [vmem:[%s1071_s15 + $0xb8] sm:$0xff]  ;;  %v433_v62 = vmin.f32 %v305_v51, 1.0  ;;  %v309_v63 = vmax.f32 %v181_v55, 0.0  ;;  %v184_v0 = vld [vmem:[%s1071_s15 + $0xc0] sm:$0xff]  ;;  %v434_v1 = vmin.f32 %v306_v54, 1.0 }
  0x2f   : > { %552 = vst [vmem:[%s1088_s16 + $0x40] sm:$0xff] %v424_v35  ;;  %v310_v2 = vmax.f32 %v182_v58, 0.0  ;;  %v185_v3 = vld [vmem:[%s1071_s15 + $0xc8] sm:$0xff]  ;;  %v435_v4 = vmin.f32 %v307_v57, 1.0  ;;  %v311_v5 = vmax.f32 %v183_v61, 0.0  ;;  %v186_v6 = vld [vmem:[%s1071_s15 + $0xd0] sm:$0xff] }
  0x30   : > { %553 = vst [vmem:[%s1088_s16 + $0x48] sm:$0xff] %v425_v38  ;;  %v436_v7 = vmin.f32 %v308_v60, 1.0  ;;  %v312_v8 = vmax.f32 %v184_v0, 0.0  ;;  %v187_v9 = vld [vmem:[%s1071_s15 + $0xd8] sm:$0xff]  ;;  %v437_v10 = vmin.f32 %v309_v63, 1.0  ;;  %v313_v11 = vmax.f32 %v185_v3, 0.0 }
  0x31   : > { %554 = vst [vmem:[%s1088_s16 + $0x50] sm:$0xff] %v426_v41  ;;  %v188_v12 = vld [vmem:[%s1071_s15 + $0xe0] sm:$0xff]  ;;  %v438_v13 = vmin.f32 %v310_v2, 1.0  ;;  %v314_v14 = vmax.f32 %v186_v6, 0.0  ;;  %v189_v15 = vld [vmem:[%s1071_s15 + $0xe8] sm:$0xff]  ;;  %v439_v16 = vmin.f32 %v311_v5, 1.0 }
  0x32   : > { %555 = vst [vmem:[%s1088_s16 + $0x58] sm:$0xff] %v427_v44  ;;  %v315_v17 = vmax.f32 %v187_v9, 0.0  ;;  %v190_v18 = vld [vmem:[%s1071_s15 + $0xf0] sm:$0xff]  ;;  %v440_v19 = vmin.f32 %v312_v8, 1.0  ;;  %v316_v20 = vmax.f32 %v188_v12, 0.0  ;;  %v191_v21 = vld [vmem:[%s1071_s15 + $0xf8] sm:$0xff] }
  0x33   : > { %556 = vst [vmem:[%s1088_s16 + $0x60] sm:$0xff] %v428_v47  ;;  %v441_v22 = vmin.f32 %v313_v11, 1.0  ;;  %v317_v23 = vmax.f32 %v189_v15, 0.0  ;;  %v192_v24 = vld [vmem:[%s1071_s15 + $0x100] sm:$0xff]  ;;  %v442_v25 = vmin.f32 %v314_v14, 1.0  ;;  %v318_v26 = vmax.f32 %v190_v18, 0.0 }
  0x34   : > { %557 = vst [vmem:[%s1088_s16 + $0x68] sm:$0xff] %v429_v50  ;;  %v193_v27 = vld [vmem:[%s1071_s15 + $0x108] sm:$0xff]  ;;  %v443_v28 = vmin.f32 %v315_v17, 1.0  ;;  %v319_v29 = vmax.f32 %v191_v21, 0.0  ;;  %v194_v30 = vld [vmem:[%s1071_s15 + $0x110] sm:$0xff]  ;;  %v444_v31 = vmin.f32 %v316_v20, 1.0 }
  0x35   : > { %558 = vst [vmem:[%s1088_s16 + $0x70] sm:$0xff] %v430_v53  ;;  %v320_v32 = vmax.f32 %v192_v24, 0.0  ;;  %v195_v33 = vld [vmem:[%s1071_s15 + $0x118] sm:$0xff]  ;;  %v445_v34 = vmin.f32 %v317_v23, 1.0  ;;  %v321_v35 = vmax.f32 %v193_v27, 0.0  ;;  %v196_v36 = vld [vmem:[%s1071_s15 + $0x120] sm:$0xff] }
  0x36   : > { %559 = vst [vmem:[%s1088_s16 + $0x78] sm:$0xff] %v431_v56  ;;  %v446_v37 = vmin.f32 %v318_v26, 1.0  ;;  %v322_v38 = vmax.f32 %v194_v30, 0.0  ;;  %v197_v39 = vld [vmem:[%s1071_s15 + $0x128] sm:$0xff]  ;;  %v447_v40 = vmin.f32 %v319_v29, 1.0  ;;  %v323_v41 = vmax.f32 %v195_v33, 0.0 }
  0x37   : > { %560 = vst [vmem:[%s1088_s16 + $0x80] sm:$0xff] %v432_v59  ;;  %v198_v42 = vld [vmem:[%s1071_s15 + $0x130] sm:$0xff]  ;;  %v448_v43 = vmin.f32 %v320_v32, 1.0  ;;  %v324_v44 = vmax.f32 %v196_v36, 0.0  ;;  %v199_v45 = vld [vmem:[%s1071_s15 + $0x138] sm:$0xff]  ;;  %v449_v46 = vmin.f32 %v321_v35, 1.0 }
  0x38   : > { %561 = vst [vmem:[%s1088_s16 + $0x88] sm:$0xff] %v433_v62  ;;  %v325_v47 = vmax.f32 %v197_v39, 0.0  ;;  %v200_v48 = vld [vmem:[%s1071_s15 + $0x140] sm:$0xff]  ;;  %v450_v49 = vmin.f32 %v322_v38, 1.0  ;;  %v326_v50 = vmax.f32 %v198_v42, 0.0  ;;  %v201_v51 = vld [vmem:[%s1071_s15 + $0x148] sm:$0xff] }
  0x39   : > { %562 = vst [vmem:[%s1088_s16 + $0x90] sm:$0xff] %v434_v1  ;;  %v451_v52 = vmin.f32 %v323_v41, 1.0  ;;  %v327_v53 = vmax.f32 %v199_v45, 0.0  ;;  %v202_v54 = vld [vmem:[%s1071_s15 + $0x150] sm:$0xff]  ;;  %v452_v55 = vmin.f32 %v324_v44, 1.0  ;;  %v328_v56 = vmax.f32 %v200_v48, 0.0 }
  0x3a   : > { %563 = vst [vmem:[%s1088_s16 + $0x98] sm:$0xff] %v435_v4  ;;  %v203_v57 = vld [vmem:[%s1071_s15 + $0x158] sm:$0xff]  ;;  %v453_v58 = vmin.f32 %v325_v47, 1.0  ;;  %v329_v59 = vmax.f32 %v201_v51, 0.0  ;;  %v204_v60 = vld [vmem:[%s1071_s15 + $0x160] sm:$0xff]  ;;  %v454_v61 = vmin.f32 %v326_v50, 1.0 }
  0x3b   : > { %564 = vst [vmem:[%s1088_s16 + $0xa0] sm:$0xff] %v436_v7  ;;  %v330_v62 = vmax.f32 %v202_v54, 0.0  ;;  %v205_v63 = vld [vmem:[%s1071_s15 + $0x168] sm:$0xff]  ;;  %v455_v0 = vmin.f32 %v327_v53, 1.0  ;;  %v331_v1 = vmax.f32 %v203_v57, 0.0  ;;  %v206_v2 = vld [vmem:[%s1071_s15 + $0x170] sm:$0xff] }
  0x3c   : > { %565 = vst [vmem:[%s1088_s16 + $0xa8] sm:$0xff] %v437_v10  ;;  %v456_v3 = vmin.f32 %v328_v56, 1.0  ;;  %v332_v4 = vmax.f32 %v204_v60, 0.0  ;;  %v207_v5 = vld [vmem:[%s1071_s15 + $0x178] sm:$0xff]  ;;  %v457_v6 = vmin.f32 %v329_v59, 1.0  ;;  %v333_v7 = vmax.f32 %v205_v63, 0.0 }
  0x3d   : > { %566 = vst [vmem:[%s1088_s16 + $0xb0] sm:$0xff] %v438_v13  ;;  %v208_v8 = vld [vmem:[%s1071_s15 + $0x180] sm:$0xff]  ;;  %v458_v9 = vmin.f32 %v330_v62, 1.0  ;;  %v334_v10 = vmax.f32 %v206_v2, 0.0  ;;  %v209_v11 = vld [vmem:[%s1071_s15 + $0x188] sm:$0xff]  ;;  %v459_v12 = vmin.f32 %v331_v1, 1.0 }
  0x3e   : > { %567 = vst [vmem:[%s1088_s16 + $0xb8] sm:$0xff] %v439_v16  ;;  %v335_v13 = vmax.f32 %v207_v5, 0.0  ;;  %v210_v14 = vld [vmem:[%s1071_s15 + $0x190] sm:$0xff]  ;;  %v460_v15 = vmin.f32 %v332_v4, 1.0  ;;  %v336_v16 = vmax.f32 %v208_v8, 0.0  ;;  %v211_v17 = vld [vmem:[%s1071_s15 + $0x198] sm:$0xff] }
  0x3f   : > { %568 = vst [vmem:[%s1088_s16 + $0xc0] sm:$0xff] %v440_v19  ;;  %v461_v18 = vmin.f32 %v333_v7, 1.0  ;;  %v337_v19 = vmax.f32 %v209_v11, 0.0  ;;  %v212_v20 = vld [vmem:[%s1071_s15 + $0x1a0] sm:$0xff]  ;;  %v462_v21 = vmin.f32 %v334_v10, 1.0  ;;  %v213_v23 = vld [vmem:[%s1071_s15 + $0x1a8] sm:$0xff] }
  0x40   : > { %569 = vst [vmem:[%s1088_s16 + $0xc8] sm:$0xff] %v441_v22  ;;  %v338_v22 = vmax.f32 %v210_v14, 0.0  ;;  %v463_v24 = vmin.f32 %v335_v13, 1.0  ;;  %v214_v26 = vld [vmem:[%s1071_s15 + $0x1b0] sm:$0xff]  ;;  %v464_v27 = vmin.f32 %v336_v16, 1.0  ;;  %v215_v29 = vld [vmem:[%s1071_s15 + $0x1b8] sm:$0xff] }
  0x41   : > { %570 = vst [vmem:[%s1088_s16 + $0xd0] sm:$0xff] %v442_v25  ;;  %v339_v25 = vmax.f32 %v211_v17, 0.0  ;;  %v465_v30 = vmin.f32 %v337_v19, 1.0  ;;  %v216_v32 = vld [vmem:[%s1071_s15 + $0x1c0] sm:$0xff]  ;;  %v217_v35 = vld [vmem:[%s1071_s15 + $0x1c8] sm:$0xff]  ;;  %v218_v38 = vld [vmem:[%s1071_s15 + $0x1d0] sm:$0xff] }
  0x42   : > { %571 = vst [vmem:[%s1088_s16 + $0xd8] sm:$0xff] %v443_v28  ;;  %v340_v28 = vmax.f32 %v212_v20, 0.0  ;;  %v466_v33 = vmin.f32 %v338_v22, 1.0  ;;  %v219_v41 = vld [vmem:[%s1071_s15 + $0x1d8] sm:$0xff]  ;;  %v220_v44 = vld [vmem:[%s1071_s15 + $0x1e0] sm:$0xff]  ;;  %v221_v47 = vld [vmem:[%s1071_s15 + $0x1e8] sm:$0xff] }
  0x43   : > { %572 = vst [vmem:[%s1088_s16 + $0xe0] sm:$0xff] %v444_v31  ;;  %v341_v31 = vmax.f32 %v213_v23, 0.0  ;;  %v467_v36 = vmin.f32 %v339_v25, 1.0  ;;  %v222_v50 = vld [vmem:[%s1071_s15 + $0x1f0] sm:$0xff]  ;;  %v223_v53 = vld [vmem:[%s1071_s15 + $0x1f8] sm:$0xff]  ;;  %v224_v56 = vld [vmem:[%s1071_s15 + $0x200] sm:$0xff] }
  0x44   : > { %573 = vst [vmem:[%s1088_s16 + $0xe8] sm:$0xff] %v445_v34  ;;  %v342_v34 = vmax.f32 %v214_v26, 0.0  ;;  %v468_v39 = vmin.f32 %v340_v28, 1.0  ;;  %v225_v59 = vld [vmem:[%s1071_s15 + $0x208] sm:$0xff]  ;;  %v226_v62 = vld [vmem:[%s1071_s15 + $0x210] sm:$0xff]  ;;  %v227_v1 = vld [vmem:[%s1071_s15 + $0x218] sm:$0xff] }
  0x45   : > { %574 = vst [vmem:[%s1088_s16 + $0xf0] sm:$0xff] %v446_v37  ;;  %v343_v37 = vmax.f32 %v215_v29, 0.0  ;;  %v469_v42 = vmin.f32 %v341_v31, 1.0  ;;  %v228_v4 = vld [vmem:[%s1071_s15 + $0x220] sm:$0xff]  ;;  %v229_v7 = vld [vmem:[%s1071_s15 + $0x228] sm:$0xff]  ;;  %v230_v10 = vld [vmem:[%s1071_s15 + $0x230] sm:$0xff] }
  0x46   : > { %575 = vst [vmem:[%s1088_s16 + $0xf8] sm:$0xff] %v447_v40  ;;  %v344_v40 = vmax.f32 %v216_v32, 0.0  ;;  %v470_v45 = vmin.f32 %v342_v34, 1.0  ;;  %v231_v13 = vld [vmem:[%s1071_s15 + $0x238] sm:$0xff]  ;;  %v232_v16 = vld [vmem:[%s1071_s15 + $0x240] sm:$0xff]  ;;  %v233_v19 = vld [vmem:[%s1071_s15 + $0x248] sm:$0xff] }
  0x47   : > { %576 = vst [vmem:[%s1088_s16 + $0x100] sm:$0xff] %v448_v43  ;;  %v345_v43 = vmax.f32 %v217_v35, 0.0  ;;  %v471_v48 = vmin.f32 %v343_v37, 1.0  ;;  %v234_v22 = vld [vmem:[%s1071_s15 + $0x250] sm:$0xff]  ;;  %v235_v25 = vld [vmem:[%s1071_s15 + $0x258] sm:$0xff]  ;;  %v236_v28 = vld [vmem:[%s1071_s15 + $0x260] sm:$0xff] }
  0x48   : > { %577 = vst [vmem:[%s1088_s16 + $0x108] sm:$0xff] %v449_v46  ;;  %v346_v46 = vmax.f32 %v218_v38, 0.0  ;;  %v472_v51 = vmin.f32 %v344_v40, 1.0  ;;  %v237_v31 = vld [vmem:[%s1071_s15 + $0x268] sm:$0xff]  ;;  %v238_v34 = vld [vmem:[%s1071_s15 + $0x270] sm:$0xff]  ;;  %v239_v37 = vld [vmem:[%s1071_s15 + $0x278] sm:$0xff] }
  0x49   : > { %578 = vst [vmem:[%s1088_s16 + $0x110] sm:$0xff] %v450_v49  ;;  %v347_v49 = vmax.f32 %v219_v41, 0.0  ;;  %v473_v54 = vmin.f32 %v345_v43, 1.0  ;;  %v240_v40 = vld [vmem:[%s1071_s15 + $0x280] sm:$0xff]  ;;  %v241_v43 = vld [vmem:[%s1071_s15 + $0x288] sm:$0xff]  ;;  %s690_s24 = sshll.u32 %s687_s23, 4  ;;  %s691_s24 = int_to_ptr.hbm [resolvable:$true] %s690_s24 }
  0x4a   : > { %579 = vst [vmem:[%s1088_s16 + $0x118] sm:$0xff] %v451_v52  ;;  %v348_v52 = vmax.f32 %v220_v44, 0.0  ;;  %v474_v57 = vmin.f32 %v346_v46, 1.0  ;;  %v242_v46 = vld [vmem:[%s1071_s15 + $0x290] sm:$0xff]  ;;  %s673_s25 = scalar_lea.sflag [#allocation4], %s1067_s5  ;;  %s909_s26 = sshra.s32 %s691_s24, 4  ;;  %s910_s26 = int_to_ptr.hbm [resolvable:$true] %s909_s26 }
  0x4b   : > { %580 = vst [vmem:[%s1088_s16 + $0x120] sm:$0xff] %v452_v55  ;;  %v349_v55 = vmax.f32 %v221_v47, 0.0  ;;  %v475_v60 = vmin.f32 %v347_v49, 1.0  ;;  %v243_v49 = vld [vmem:[%s1071_s15 + $0x298] sm:$0xff]  ;;  %s911_s27 = scalar_lea.hbm %s910_s26, 1024  ;;  %s915_s30 = scalar_lea.hbm %s1375_s1, 2048 }
  0x4c   : > { %581 = vst [vmem:[%s1088_s16 + $0x128] sm:$0xff] %v453_v58  ;;  %v350_v58 = vmax.f32 %v222_v50, 0.0  ;;  %v476_v63 = vmin.f32 %v348_v52, 1.0  ;;  %v244_v52 = vld [vmem:[%s1071_s15 + $0x2a0] sm:$0xff]  ;;  %p912_p4 = scmp.ne.s32.totalorder %s910_s26, %s911_s27  ;;  %p916_p7 = scmp.lt.s32.totalorder %s910_s26, %s1375_s1 }
  0x4d   : > { %582 = vst [vmem:[%s1088_s16 + $0x130] sm:$0xff] %v454_v61  ;;  %v351_v61 = vmax.f32 %v223_v53, 0.0  ;;  %v477_v2 = vmin.f32 %v349_v55, 1.0  ;;  %v245_v55 = vld [vmem:[%s1071_s15 + $0x2a8] sm:$0xff]  ;;  %p917_p8 = scmp.lt.s32.totalorder %s915_s30, %s911_s27 }
  0x4e   : > { %583 = vst [vmem:[%s1088_s16 + $0x138] sm:$0xff] %v455_v0  ;;  %v352_v0 = vmax.f32 %v224_v56, 0.0  ;;  %v478_v5 = vmin.f32 %v350_v58, 1.0  ;;  %v246_v58 = vld [vmem:[%s1071_s15 + $0x2b0] sm:$0xff]  ;;  %p913_p5 = pnand %p912_p4, %p1044_p9 }
  0x4f   : > { %584 = vst [vmem:[%s1088_s16 + $0x140] sm:$0xff] %v456_v3  ;;  %v353_v3 = vmax.f32 %v225_v59, 0.0  ;;  %v479_v8 = vmin.f32 %v351_v61, 1.0  ;;  %v247_v61 = vld [vmem:[%s1071_s15 + $0x2b8] sm:$0xff]  ;;  %p918_p10 = por %p917_p8, %p916_p7 }
  0x50   : > { %585 = vst [vmem:[%s1088_s16 + $0x148] sm:$0xff] %v457_v6  ;;  %v354_v6 = vmax.f32 %v226_v62, 0.0  ;;  %v480_v11 = vmin.f32 %v352_v0, 1.0  ;;  %v248_v0 = vld [vmem:[%s1071_s15 + $0x2c0] sm:$0xff]  ;;  %p914_p6 = pneg %p913_p5 }
  0x51   : > { %586 = vst [vmem:[%s1088_s16 + $0x150] sm:$0xff] %v458_v9  ;;  %v355_v9 = vmax.f32 %v227_v1, 0.0  ;;  %v481_v14 = vmin.f32 %v353_v3, 1.0  ;;  %v249_v3 = vld [vmem:[%s1071_s15 + $0x2c8] sm:$0xff] }
  0x52   : > { %587 = vst [vmem:[%s1088_s16 + $0x158] sm:$0xff] %v459_v12  ;;  %v356_v12 = vmax.f32 %v228_v4, 0.0  ;;  %v482_v17 = vmin.f32 %v354_v6, 1.0  ;;  %v250_v6 = vld [vmem:[%s1071_s15 + $0x2d0] sm:$0xff]  ;;  %p919_p13 = pnand %p918_p10, %p914_p6 }
  0x53   : > { %588 = vst [vmem:[%s1088_s16 + $0x160] sm:$0xff] %v460_v15  ;;  %v357_v15 = vmax.f32 %v229_v7, 0.0  ;;  %v483_v20 = vmin.f32 %v355_v9, 1.0  ;;  %v251_v9 = vld [vmem:[%s1071_s15 + $0x2d8] sm:$0xff] }
  0x54   : > { %589 = vst [vmem:[%s1088_s16 + $0x168] sm:$0xff] %v461_v18  ;;  %v358_v18 = vmax.f32 %v230_v10, 0.0  ;;  %v484_v23 = vmin.f32 %v356_v12, 1.0  ;;  %v252_v12 = vld [vmem:[%s1071_s15 + $0x2e0] sm:$0xff] }
  0x55   : > { %590 = vst [vmem:[%s1088_s16 + $0x170] sm:$0xff] %v462_v21  ;;  %v359_v21 = vmax.f32 %v231_v13, 0.0  ;;  %v485_v26 = vmin.f32 %v357_v15, 1.0  ;;  %v253_v15 = vld [vmem:[%s1071_s15 + $0x2e8] sm:$0xff] }
  0x56   : > { %591 = vst [vmem:[%s1088_s16 + $0x178] sm:$0xff] %v463_v24  ;;  %v360_v24 = vmax.f32 %v232_v16, 0.0  ;;  %v486_v29 = vmin.f32 %v358_v18, 1.0  ;;  %v254_v18 = vld [vmem:[%s1071_s15 + $0x2f0] sm:$0xff] }
  0x57   : > { %592 = vst [vmem:[%s1088_s16 + $0x180] sm:$0xff] %v464_v27  ;;  %v361_v27 = vmax.f32 %v233_v19, 0.0  ;;  %v487_v32 = vmin.f32 %v359_v21, 1.0  ;;  %v255_v21 = vld [vmem:[%s1071_s15 + $0x2f8] sm:$0xff] }
  0x58   : > { %593 = vst [vmem:[%s1088_s16 + $0x188] sm:$0xff] %v465_v30  ;;  %v362_v30 = vmax.f32 %v234_v22, 0.0  ;;  %v488_v35 = vmin.f32 %v360_v24, 1.0  ;;  %v256_v24 = vld [vmem:[%s1071_s15 + $0x300] sm:$0xff] }
  0x59   : > { %594 = vst [vmem:[%s1088_s16 + $0x190] sm:$0xff] %v466_v33  ;;  %v363_v33 = vmax.f32 %v235_v25, 0.0  ;;  %v489_v38 = vmin.f32 %v361_v27, 1.0  ;;  %v257_v27 = vld [vmem:[%s1071_s15 + $0x308] sm:$0xff] }
  0x5a   : > { %595 = vst [vmem:[%s1088_s16 + $0x198] sm:$0xff] %v467_v36  ;;  %v364_v36 = vmax.f32 %v236_v28, 0.0  ;;  %v490_v41 = vmin.f32 %v362_v30, 1.0  ;;  %v258_v30 = vld [vmem:[%s1071_s15 + $0x310] sm:$0xff] }
  0x5b   : > { %596 = vst [vmem:[%s1088_s16 + $0x1a0] sm:$0xff] %v468_v39  ;;  %v365_v39 = vmax.f32 %v237_v31, 0.0  ;;  %v491_v44 = vmin.f32 %v363_v33, 1.0  ;;  %v259_v33 = vld [vmem:[%s1071_s15 + $0x318] sm:$0xff] }
  0x5c   : > { %597 = vst [vmem:[%s1088_s16 + $0x1a8] sm:$0xff] %v469_v42  ;;  %v366_v42 = vmax.f32 %v238_v34, 0.0  ;;  %v492_v47 = vmin.f32 %v364_v36, 1.0  ;;  %v260_v36 = vld [vmem:[%s1071_s15 + $0x320] sm:$0xff] }
  0x5d   : > { %598 = vst [vmem:[%s1088_s16 + $0x1b0] sm:$0xff] %v470_v45  ;;  %v367_v45 = vmax.f32 %v239_v37, 0.0  ;;  %v493_v50 = vmin.f32 %v365_v39, 1.0  ;;  %v261_v39 = vld [vmem:[%s1071_s15 + $0x328] sm:$0xff] }
  0x5e   : > { %599 = vst [vmem:[%s1088_s16 + $0x1b8] sm:$0xff] %v471_v48  ;;  %v368_v48 = vmax.f32 %v240_v40, 0.0  ;;  %v494_v53 = vmin.f32 %v366_v42, 1.0  ;;  %v262_v42 = vld [vmem:[%s1071_s15 + $0x330] sm:$0xff] }
  0x5f   : > { %600 = vst [vmem:[%s1088_s16 + $0x1c0] sm:$0xff] %v472_v51  ;;  %v369_v51 = vmax.f32 %v241_v43, 0.0  ;;  %v495_v56 = vmin.f32 %v367_v45, 1.0  ;;  %v263_v45 = vld [vmem:[%s1071_s15 + $0x338] sm:$0xff] }
  0x60   : > { %601 = vst [vmem:[%s1088_s16 + $0x1c8] sm:$0xff] %v473_v54  ;;  %v370_v54 = vmax.f32 %v242_v46, 0.0  ;;  %v496_v59 = vmin.f32 %v368_v48, 1.0  ;;  %v264_v48 = vld [vmem:[%s1071_s15 + $0x340] sm:$0xff] }
  0x61   : > { %602 = vst [vmem:[%s1088_s16 + $0x1d0] sm:$0xff] %v474_v57  ;;  %v371_v57 = vmax.f32 %v243_v49, 0.0  ;;  %v497_v62 = vmin.f32 %v369_v51, 1.0  ;;  %v265_v51 = vld [vmem:[%s1071_s15 + $0x348] sm:$0xff] }
  0x62   : > { %603 = vst [vmem:[%s1088_s16 + $0x1d8] sm:$0xff] %v475_v60  ;;  %v372_v60 = vmax.f32 %v244_v52, 0.0  ;;  %v498_v1 = vmin.f32 %v370_v54, 1.0  ;;  %v266_v54 = vld [vmem:[%s1071_s15 + $0x350] sm:$0xff] }
  0x63   : > { %604 = vst [vmem:[%s1088_s16 + $0x1e0] sm:$0xff] %v476_v63  ;;  %v373_v63 = vmax.f32 %v245_v55, 0.0  ;;  %v499_v4 = vmin.f32 %v371_v57, 1.0  ;;  %v267_v57 = vld [vmem:[%s1071_s15 + $0x358] sm:$0xff] }
  0x64   : > { %605 = vst [vmem:[%s1088_s16 + $0x1e8] sm:$0xff] %v477_v2  ;;  %v374_v2 = vmax.f32 %v246_v58, 0.0  ;;  %v500_v7 = vmin.f32 %v372_v60, 1.0  ;;  %v268_v60 = vld [vmem:[%s1071_s15 + $0x360] sm:$0xff] }
  0x65   : > { %606 = vst [vmem:[%s1088_s16 + $0x1f0] sm:$0xff] %v478_v5  ;;  %v375_v5 = vmax.f32 %v247_v61, 0.0  ;;  %v501_v10 = vmin.f32 %v373_v63, 1.0  ;;  %v269_v63 = vld [vmem:[%s1071_s15 + $0x368] sm:$0xff] }
  0x66   : > { %607 = vst [vmem:[%s1088_s16 + $0x1f8] sm:$0xff] %v479_v8  ;;  %v376_v8 = vmax.f32 %v248_v0, 0.0  ;;  %v502_v13 = vmin.f32 %v374_v2, 1.0  ;;  %v270_v2 = vld [vmem:[%s1071_s15 + $0x370] sm:$0xff] }
  0x67   : > { %608 = vst [vmem:[%s1088_s16 + $0x200] sm:$0xff] %v480_v11  ;;  %v377_v11 = vmax.f32 %v249_v3, 0.0  ;;  %v503_v16 = vmin.f32 %v375_v5, 1.0  ;;  %v271_v5 = vld [vmem:[%s1071_s15 + $0x378] sm:$0xff] }
  0x68   : > { %609 = vst [vmem:[%s1088_s16 + $0x208] sm:$0xff] %v481_v14  ;;  %v378_v14 = vmax.f32 %v250_v6, 0.0  ;;  %v504_v19 = vmin.f32 %v376_v8, 1.0  ;;  %v272_v8 = vld [vmem:[%s1071_s15 + $0x380] sm:$0xff] }
  0x69   : > { %610 = vst [vmem:[%s1088_s16 + $0x210] sm:$0xff] %v482_v17  ;;  %v379_v17 = vmax.f32 %v251_v9, 0.0  ;;  %v505_v22 = vmin.f32 %v377_v11, 1.0  ;;  %v273_v11 = vld [vmem:[%s1071_s15 + $0x388] sm:$0xff] }
  0x6a   : > { %611 = vst [vmem:[%s1088_s16 + $0x218] sm:$0xff] %v483_v20  ;;  %v380_v20 = vmax.f32 %v252_v12, 0.0  ;;  %v506_v25 = vmin.f32 %v378_v14, 1.0  ;;  %v274_v14 = vld [vmem:[%s1071_s15 + $0x390] sm:$0xff] }
  0x6b   : > { %612 = vst [vmem:[%s1088_s16 + $0x220] sm:$0xff] %v484_v23  ;;  %v381_v23 = vmax.f32 %v253_v15, 0.0  ;;  %v507_v28 = vmin.f32 %v379_v17, 1.0  ;;  %v275_v17 = vld [vmem:[%s1071_s15 + $0x398] sm:$0xff] }
  0x6c   : > { %613 = vst [vmem:[%s1088_s16 + $0x228] sm:$0xff] %v485_v26  ;;  %v382_v26 = vmax.f32 %v254_v18, 0.0  ;;  %v508_v31 = vmin.f32 %v380_v20, 1.0  ;;  %v276_v20 = vld [vmem:[%s1071_s15 + $0x3a0] sm:$0xff] }
  0x6d   : > { %614 = vst [vmem:[%s1088_s16 + $0x230] sm:$0xff] %v486_v29  ;;  %v383_v29 = vmax.f32 %v255_v21, 0.0  ;;  %v509_v34 = vmin.f32 %v381_v23, 1.0  ;;  %v277_v23 = vld [vmem:[%s1071_s15 + $0x3a8] sm:$0xff] }
  0x6e   : > { %615 = vst [vmem:[%s1088_s16 + $0x238] sm:$0xff] %v487_v32  ;;  %v384_v32 = vmax.f32 %v256_v24, 0.0  ;;  %v510_v37 = vmin.f32 %v382_v26, 1.0  ;;  %v278_v26 = vld [vmem:[%s1071_s15 + $0x3b0] sm:$0xff] }
  0x6f   : > { %616 = vst [vmem:[%s1088_s16 + $0x240] sm:$0xff] %v488_v35  ;;  %v385_v35 = vmax.f32 %v257_v27, 0.0  ;;  %v511_v40 = vmin.f32 %v383_v29, 1.0  ;;  %v279_v29 = vld [vmem:[%s1071_s15 + $0x3b8] sm:$0xff] }
  0x70   : > { %617 = vst [vmem:[%s1088_s16 + $0x248] sm:$0xff] %v489_v38  ;;  %v386_v38 = vmax.f32 %v258_v30, 0.0  ;;  %v512_v43 = vmin.f32 %v384_v32, 1.0  ;;  %v280_v32 = vld [vmem:[%s1071_s15 + $0x3c0] sm:$0xff] }
  0x71   : > { %618 = vst [vmem:[%s1088_s16 + $0x250] sm:$0xff] %v490_v41  ;;  %v387_v41 = vmax.f32 %v259_v33, 0.0  ;;  %v513_v46 = vmin.f32 %v385_v35, 1.0  ;;  %v281_v35 = vld [vmem:[%s1071_s15 + $0x3c8] sm:$0xff] }
  0x72   : > { %619 = vst [vmem:[%s1088_s16 + $0x258] sm:$0xff] %v491_v44  ;;  %v388_v44 = vmax.f32 %v260_v36, 0.0  ;;  %v514_v49 = vmin.f32 %v386_v38, 1.0  ;;  %v282_v38 = vld [vmem:[%s1071_s15 + $0x3d0] sm:$0xff] }
  0x73   : > { %620 = vst [vmem:[%s1088_s16 + $0x260] sm:$0xff] %v492_v47  ;;  %v389_v47 = vmax.f32 %v261_v39, 0.0  ;;  %v515_v52 = vmin.f32 %v387_v41, 1.0  ;;  %v283_v41 = vld [vmem:[%s1071_s15 + $0x3d8] sm:$0xff] }
  0x74   : > { %621 = vst [vmem:[%s1088_s16 + $0x268] sm:$0xff] %v493_v50  ;;  %v390_v50 = vmax.f32 %v262_v42, 0.0  ;;  %v516_v55 = vmin.f32 %v388_v44, 1.0  ;;  %v284_v44 = vld [vmem:[%s1071_s15 + $0x3e0] sm:$0xff] }
  0x75   : > { %622 = vst [vmem:[%s1088_s16 + $0x270] sm:$0xff] %v494_v53  ;;  %v391_v53 = vmax.f32 %v263_v45, 0.0  ;;  %v517_v58 = vmin.f32 %v389_v47, 1.0  ;;  %v285_v47 = vld [vmem:[%s1071_s15 + $0x3e8] sm:$0xff] }
  0x76   : > { %623 = vst [vmem:[%s1088_s16 + $0x278] sm:$0xff] %v495_v56  ;;  %v392_v56 = vmax.f32 %v264_v48, 0.0  ;;  %v518_v61 = vmin.f32 %v390_v50, 1.0  ;;  %v286_v50 = vld [vmem:[%s1071_s15 + $0x3f0] sm:$0xff] }
  0x77   : > { %624 = vst [vmem:[%s1088_s16 + $0x280] sm:$0xff] %v496_v59  ;;  %v393_v59 = vmax.f32 %v265_v51, 0.0  ;;  %v519_v0 = vmin.f32 %v391_v53, 1.0  ;;  %v287_v53 = vld [vmem:[%s1071_s15 + $0x3f8] sm:$0xff] }
  0x78   : > { %625 = vst [vmem:[%s1088_s16 + $0x288] sm:$0xff] %v497_v62  ;;  %v394_v62 = vmax.f32 %v266_v54, 0.0  ;;  %v520_v3 = vmin.f32 %v392_v56, 1.0 }
  0x79   : > { %626 = vst [vmem:[%s1088_s16 + $0x290] sm:$0xff] %v498_v1  ;;  %v395_v1 = vmax.f32 %v267_v57, 0.0  ;;  %v521_v6 = vmin.f32 %v393_v59, 1.0  ;;  %v414_v57 = vmax.f32 %v286_v50, 0.0  ;;  %v415_v59 = vmax.f32 %v287_v53, 0.0 }
  0x7a   : > { %627 = vst [vmem:[%s1088_s16 + $0x298] sm:$0xff] %v499_v4  ;;  %v396_v4 = vmax.f32 %v268_v60, 0.0  ;;  %v522_v9 = vmin.f32 %v394_v62, 1.0 }
  0x7b   : > { %628 = vst [vmem:[%s1088_s16 + $0x2a0] sm:$0xff] %v500_v7  ;;  %v397_v7 = vmax.f32 %v269_v63, 0.0  ;;  %v523_v12 = vmin.f32 %v395_v1, 1.0  ;;  %v542_v62 = vmin.f32 %v414_v57, 1.0  ;;  %v543_v63 = vmin.f32 %v415_v59, 1.0 }
  0x7c   : > { %629 = vst [vmem:[%s1088_s16 + $0x2a8] sm:$0xff] %v501_v10  ;;  %v398_v10 = vmax.f32 %v270_v2, 0.0  ;;  %v524_v15 = vmin.f32 %v396_v4, 1.0 }
  0x7d   : > { %630 = vst [vmem:[%s1088_s16 + $0x2b0] sm:$0xff] %v502_v13  ;;  %v399_v13 = vmax.f32 %v271_v5, 0.0  ;;  %v525_v18 = vmin.f32 %v397_v7, 1.0 }
  0x7e   : > { %631 = vst [vmem:[%s1088_s16 + $0x2b8] sm:$0xff] %v503_v16  ;;  %v400_v16 = vmax.f32 %v272_v8, 0.0  ;;  %v526_v21 = vmin.f32 %v398_v10, 1.0 }
  0x7f   : > { %632 = vst [vmem:[%s1088_s16 + $0x2c0] sm:$0xff] %v504_v19  ;;  %v401_v19 = vmax.f32 %v273_v11, 0.0  ;;  %v527_v24 = vmin.f32 %v399_v13, 1.0 }
  0x80   : > { %633 = vst [vmem:[%s1088_s16 + $0x2c8] sm:$0xff] %v505_v22  ;;  %v402_v22 = vmax.f32 %v274_v14, 0.0  ;;  %v528_v27 = vmin.f32 %v400_v16, 1.0 }
  0x81   : > { %634 = vst [vmem:[%s1088_s16 + $0x2d0] sm:$0xff] %v506_v25  ;;  %v403_v25 = vmax.f32 %v275_v17, 0.0  ;;  %v529_v30 = vmin.f32 %v401_v19, 1.0 }
  0x82   : > { %635 = vst [vmem:[%s1088_s16 + $0x2d8] sm:$0xff] %v507_v28  ;;  %v404_v28 = vmax.f32 %v276_v20, 0.0  ;;  %v530_v33 = vmin.f32 %v402_v22, 1.0 }
  0x83   : > { %636 = vst [vmem:[%s1088_s16 + $0x2e0] sm:$0xff] %v508_v31  ;;  %v405_v31 = vmax.f32 %v277_v23, 0.0  ;;  %v531_v36 = vmin.f32 %v403_v25, 1.0 }
  0x84   : > { %637 = vst [vmem:[%s1088_s16 + $0x2e8] sm:$0xff] %v509_v34  ;;  %v406_v34 = vmax.f32 %v278_v26, 0.0  ;;  %v532_v39 = vmin.f32 %v404_v28, 1.0 }
  0x85   : > { %638 = vst [vmem:[%s1088_s16 + $0x2f0] sm:$0xff] %v510_v37  ;;  %v407_v37 = vmax.f32 %v279_v29, 0.0  ;;  %v533_v42 = vmin.f32 %v405_v31, 1.0 }
  0x86   : > { %639 = vst [vmem:[%s1088_s16 + $0x2f8] sm:$0xff] %v511_v40  ;;  %v408_v40 = vmax.f32 %v280_v32, 0.0  ;;  %v534_v45 = vmin.f32 %v406_v34, 1.0 }
  0x87   : > { %640 = vst [vmem:[%s1088_s16 + $0x300] sm:$0xff] %v512_v43  ;;  %v409_v43 = vmax.f32 %v281_v35, 0.0  ;;  %v535_v48 = vmin.f32 %v407_v37, 1.0 }
  0x88   : > { %641 = vst [vmem:[%s1088_s16 + $0x308] sm:$0xff] %v513_v46  ;;  %v410_v46 = vmax.f32 %v282_v38, 0.0  ;;  %v536_v51 = vmin.f32 %v408_v40, 1.0 }
  0x89   : > { %642 = vst [vmem:[%s1088_s16 + $0x310] sm:$0xff] %v514_v49  ;;  %v411_v49 = vmax.f32 %v283_v41, 0.0  ;;  %v537_v54 = vmin.f32 %v409_v43, 1.0 }
  0x8a   : > { %643 = vst [vmem:[%s1088_s16 + $0x318] sm:$0xff] %v515_v52  ;;  %v412_v52 = vmax.f32 %v284_v44, 0.0  ;;  %v538_v56 = vmin.f32 %v410_v46, 1.0 }
  0x8b   : > { %644 = vst [vmem:[%s1088_s16 + $0x320] sm:$0xff] %v516_v55  ;;  %v413_v55 = vmax.f32 %v285_v47, 0.0 }
  0x8c   : > { %645 = vst [vmem:[%s1088_s16 + $0x328] sm:$0xff] %v517_v58  ;;  %v539_v58 = vmin.f32 %v411_v49, 1.0  ;;  %v540_v60 = vmin.f32 %v412_v52, 1.0 }
  0x8d   : > { %646 = vst [vmem:[%s1088_s16 + $0x330] sm:$0xff] %v518_v61  ;;  %v541_v61 = vmin.f32 %v413_v55, 1.0 }
  0x8e   : > { %647 = vst [vmem:[%s1088_s16 + $0x338] sm:$0xff] %v519_v0 }
  0x8f   : > { %648 = vst [vmem:[%s1088_s16 + $0x340] sm:$0xff] %v520_v3 }
  0x90   : > { %649 = vst [vmem:[%s1088_s16 + $0x348] sm:$0xff] %v521_v6 }
  0x91   : > { %650 = vst [vmem:[%s1088_s16 + $0x350] sm:$0xff] %v522_v9 }
  0x92   : > { %651 = vst [vmem:[%s1088_s16 + $0x358] sm:$0xff] %v523_v12 }
  0x93   : > { %652 = vst [vmem:[%s1088_s16 + $0x360] sm:$0xff] %v524_v15 }
  0x94   : > { %653 = vst [vmem:[%s1088_s16 + $0x368] sm:$0xff] %v525_v18 }
  0x95   : > { %654 = vst [vmem:[%s1088_s16 + $0x370] sm:$0xff] %v526_v21 }
  0x96   : > { %655 = vst [vmem:[%s1088_s16 + $0x378] sm:$0xff] %v527_v24 }
  0x97   : > { %656 = vst [vmem:[%s1088_s16 + $0x380] sm:$0xff] %v528_v27 }
  0x98   : > { %657 = vst [vmem:[%s1088_s16 + $0x388] sm:$0xff] %v529_v30 }
  0x99   : > { %658 = vst [vmem:[%s1088_s16 + $0x390] sm:$0xff] %v530_v33 }
  0x9a   : > { %659 = vst [vmem:[%s1088_s16 + $0x398] sm:$0xff] %v531_v36 }
  0x9b   : > { %660 = vst [vmem:[%s1088_s16 + $0x3a0] sm:$0xff] %v532_v39 }
  0x9c   : > { %661 = vst [vmem:[%s1088_s16 + $0x3a8] sm:$0xff] %v533_v42 }
  0x9d   : > { %662 = vst [vmem:[%s1088_s16 + $0x3b0] sm:$0xff] %v534_v45 }
  0x9e   : > { %663 = vst [vmem:[%s1088_s16 + $0x3b8] sm:$0xff] %v535_v48 }
  0x9f   : > { %664 = vst [vmem:[%s1088_s16 + $0x3c0] sm:$0xff] %v536_v51 }
  0xa0   : > { %665 = vst [vmem:[%s1088_s16 + $0x3c8] sm:$0xff] %v537_v54 }
  0xa1   : > { %666 = vst [vmem:[%s1088_s16 + $0x3d0] sm:$0xff] %v538_v56 }
  0xa2   : > { %667 = vst [vmem:[%s1088_s16 + $0x3d8] sm:$0xff] %v539_v58 }
  0xa3   : > { %668 = vst [vmem:[%s1088_s16 + $0x3e0] sm:$0xff] %v540_v60 }
  0xa4   : > { %669 = vst [vmem:[%s1088_s16 + $0x3e8] sm:$0xff] %v541_v61 }
  0xa5   : > { %670 = vst [vmem:[%s1088_s16 + $0x3f0] sm:$0xff] %v542_v62 }
  0xa6   : > { %671 = vst [vmem:[%s1088_s16 + $0x3f8] sm:$0xff] %v543_v63 }
  0xa7   : > { %922 = shalt.err (!%p919_p13)
}
  0xa8   : > { %s981_s4 = smov 256   ;;  %s982_s5 = smov 16  }
  0xa9   : > { %801 = dma.vmem_to_hbm [thread:$0]  (%p1044_p9), %s689_s9, 16384, %s691_s24, %s673_s25, %s981_s4, %s981_s4, %s982_s5  }
  0xaa PF: > { %s705_s12 = sand.u32 1, %s957_s6   ;;  %p808_p0 = pnand %p781_p12, %p1051_p11 }
  0xab   : > { %s706_s13 = scalar_lea.sflag [#allocation4], %s705_s12 }
  0xac   : > { %p809_p1 = pneg %p808_p0 }
  0xae   : > { %952 = dma.done.wait (%p809_p1), %s706_s13, 16384  }
  0xaf   : > { %954 = vsyncadd (%p809_p1), %s706_s13, 4294950912  ;;  %s17_s11 = sadd.s32 1, %s977_s11   ;;  %s1380_s6 = smov %s961_s7 }
  0xb0   : > { %p14_p2 = scmp.ge.s32.totalorder %s17_s11, 4   ;;  %s1381_s7 = smov %s965_s8 }
  0xb1   : > { %s1382_s8 = smov %s1049_s20  ;;  %s1383_s9 = smov %s973_s10 }
  0xb2   : > { %s1384_s10 = smov %s1386_s14  ;;  %16 = sbr.rel (!%p14_p2) target bundleno = 6 (0x6), region = 69 }
  0xb7   :  { %712 = vsyncpa [#allocation3], 1 }
  0xb8   :  { %714 = vsyncpa [#allocation3 + $0x1], 1 }
  0xb9   :  { %715 = vsyncpa [#allocation4], 1 }
  0xba   :  { %717 = vsyncpa [#allocation4 + $0x1], 1 }

</bundles_post_ra>
